<compile_context>
chip_gen: v5e
topology: v5e:2x2
jax: 0.10.0
libtpu: 0.0.40
codegen_flags: <defaults>
</compile_context>

<pallas_src>
import functools
import math

import jax
import jax.numpy as jnp
from jax.experimental import pallas as pl
from jax.experimental.pallas import tpu as pltpu


_BN_EPS = 1e-5
_SUBLANE = 8


def _round_up(x, m):
    return (x + m - 1) // m * m


def _gelu_exact(x):
    # Exact (erf-based) GELU, matching PyTorch's default nn.GELU().
    return 0.5 * x * (1.0 + jax.lax.erf(x * jnp.float32(0.7071067811865476)))


def _res_conv_block_kernel(x_ref, w1_ref, b1_ref, w2_ref, b2_ref, o_ref, x1s_ref,
                           *, h, w, margin, is_res, same_channels):
    """One image per grid step.

    x_ref  : (1, Cin_p, margin + H*W + margin)  flat-padded input (channels on sublanes)
    w*_ref : (Cout_p, 9*C_p)                    tap-packed, BN-scale-folded weights
    b*_ref : (Cout_p, 1)                        folded conv-bias + BN shift
    o_ref  : (1, Cout_p, H*W)                   lane-dense output
    x1s_ref: VMEM (Cout_p, margin + H*W + margin) staging buffer for conv2's input
    """
    hw = h * w

    # x-boundary masks; the y-boundary is handled exactly by the zero flat margins.
    pos = jax.lax.broadcasted_iota(jnp.int32, (1, hw), 1)
    col = (pos & (w - 1)) if (w & (w - 1)) == 0 else (pos % w)
    mask_xm = col >= 1            # taps that read column x-1
    mask_xp = col <= (w - 2)      # taps that read column x+1

    def conv3x3(read, w_packed, bias):
        # Single tap-packed matmul per conv, accumulated in registers.
        pieces = []
        for dy in (-1, 0, 1):
            for dx in (-1, 0, 1):
                xt = read(margin + dy * w + dx)          # (C_p, hw), static offsets
                if dx == -1:
                    xt = jnp.where(mask_xm, xt, 0.0)
                elif dx == 1:
                    xt = jnp.where(mask_xp, xt, 0.0)
                pieces.append(xt)
        stacked = jnp.concatenate(pieces, axis=0)        # (9*C_p, hw), 8-row aligned
        acc = jnp.dot(w_packed, stacked, preferred_element_type=jnp.float32)
        return acc + bias                                 # (Cout_p, hw)

    # ---- conv1 (+ folded BN) + GELU ----------------------------------------
    x1 = _gelu_exact(conv3x3(lambda s: x_ref[0, :, pl.ds(s, hw)],
                             w1_ref[...], b1_ref[...]))

    # ---- stage x1 into the flat-padded scratch for conv2 --------------------
    # Margins are re-zeroed every step (zeroing only at program_id==0 would be
    # unsafe once the batch grid is sharded across TensorCores); the interior is
    # fully overwritten, so only the two small margin strips are cleared.
    cout_p = x1s_ref.shape[0]
    zeros_margin = jnp.zeros((cout_p, margin), jnp.float32)
    x1s_ref[:, pl.ds(0, margin)] = zeros_margin
    x1s_ref[:, pl.ds(margin + hw, margin)] = zeros_margin
    x1s_ref[:, pl.ds(margin, hw)] = x1

    # ---- conv2 (+ folded BN) + GELU ----------------------------------------
    x2 = _gelu_exact(conv3x3(lambda s: x1s_ref[:, pl.ds(s, hw)],
                             w2_ref[...], b2_ref[...]))

    # ---- residual (static specialization, mirrors the PyTorch branches) -----
    if is_res:
        if same_channels:
            out = x_ref[0, :, pl.ds(margin, hw)] + x2
        else:
            out = x1 + x2
    else:
        out = x2

    o_ref[0] = out.astype(o_ref.dtype)


@functools.partial(jax.jit, static_argnames=("is_res",))
def residual_conv_block(x_nchw, params, *, is_res):
    """Forward pass of ResidualConvBlock.  x_nchw: (N, C_in, H, W) float32."""
    (w1, b1, g1, be1, m1, v1, w2, b2, g2, be2, m2, v2) = params
    n, cin, h, w = x_nchw.shape
    cout = w1.shape[0]
    same_channels = (cin == cout)
    hw = h * w
    margin = w + 1                      # covers the largest tap offset (W+1)
    length = hw + 2 * margin
    cin_p = _round_up(cin, _SUBLANE)
    cout_p = _round_up(cout, _SUBLANE)

    # NCHW -> (N, C, H*W), channel pad to a sublane multiple (8) only, flat spatial
    # zero margin.  Under jit this is a single fused pad; HBM bytes stay ~1x raw.
    x_flat = x_nchw.astype(jnp.float32).reshape(n, cin, hw)
    x_flat = jnp.pad(x_flat, ((0, 0), (0, cin_p - cin), (margin, margin)))

    def fold(wt, cb, gamma, beta, mean, var, ci, ci_p):
        # Fold eval-mode BN into the conv: W' = W*scale (per out-channel),
        # b' = (conv_b - mean)*scale + beta.  Pack the 9 taps into the K dim.
        scale = (gamma / jnp.sqrt(var + _BN_EPS)).astype(jnp.float32)
        bias = ((cb - mean) * scale + beta).astype(jnp.float32)
        wt = wt.astype(jnp.float32) * scale[:, None, None, None]        # OIHW
        wt = jnp.transpose(wt, (0, 2, 3, 1))                            # (O, 3, 3, I)
        wt = jnp.pad(wt, ((0, cout_p - cout), (0, 0), (0, 0), (0, ci_p - ci)))
        wt = wt.reshape(cout_p, 9 * ci_p)                                # tap-packed K
        bias = jnp.pad(bias, (0, cout_p - cout)).reshape(cout_p, 1)
        return wt, bias

    w1p, b1p = fold(w1, b1, g1, be1, m1, v1, cin, cin_p)
    w2p, b2p = fold(w2, b2, g2, be2, m2, v2, cout, cout_p)

    kernel = functools.partial(_res_conv_block_kernel, h=h, w=w, margin=margin,
                               is_res=is_res, same_channels=same_channels)

    out_flat = pl.pallas_call(
        kernel,
        out_shape=jax.ShapeDtypeStruct((n, cout_p, hw), jnp.float32),
        grid_spec=pltpu.PrefetchScalarGridSpec(
            num_scalar_prefetch=0,
            grid=(n,),
            in_specs=[
                # activations: one image per grid step (double-buffered)
                pl.BlockSpec((1, cin_p, length), lambda i: (i, 0, 0)),
                # tap-packed, BN-folded weights + biases: resident across the grid
                pl.BlockSpec((cout_p, 9 * cin_p), lambda i: (0, 0)),
                pl.BlockSpec((cout_p, 1), lambda i: (0, 0)),
                pl.BlockSpec((cout_p, 9 * cout_p), lambda i: (0, 0)),
                pl.BlockSpec((cout_p, 1), lambda i: (0, 0)),
            ],
            out_specs=pl.BlockSpec((1, cout_p, hw), lambda i: (i, 0, 0)),
            scratch_shapes=[pltpu.VMEM((cout_p, length), jnp.float32)],
        ),
        compiler_params=pltpu.CompilerParams(
            dimension_semantics=("parallel",),   # batch axis shards across TCs (v7x)
        ),
    )(x_flat, w1p, b1p, w2p, b2p)

    # Drop channel padding (if any) and restore NCHW -- a free reshape.
    return out_flat[:, :cout, :].reshape(n, cout, h, w)


# ----------------------------- reference & test -----------------------------

def _reference(x_nchw, params, *, is_res):
    (w1, b1, g1, be1, m1, v1, w2, b2, g2, be2, m2, v2) = params

    def conv_bn_gelu(x, wt, cb, gamma, beta, mean, var):
        y = jax.lax.conv_general_dilated(
            x, wt, window_strides=(1, 1), padding=((1, 1), (1, 1)),
            dimension_numbers=("NCHW", "OIHW", "NCHW"))
        y = y + cb[None, :, None, None]
        y = (y - mean[None, :, None, None]) / jnp.sqrt(var[None, :, None, None] + _BN_EPS)
        y = gamma[None, :, None, None] * y + beta[None, :, None, None]
        return 0.5 * y * (1.0 + jax.lax.erf(y * (1.0 / math.sqrt(2.0))))

    x1 = conv_bn_gelu(x_nchw, w1, b1, g1, be1, m1, v1)
    x2 = conv_bn_gelu(x1, w2, b2, g2, be2, m2, v2)
    if is_res:
        return x_nchw + x2 if x_nchw.shape[1] == x2.shape[1] else x1 + x2
    return x2


def _make_params(key, cin, cout):
    ks = jax.random.split(key, 14)
    k1 = 1.0 / math.sqrt(cin * 9)
    k2 = 1.0 / math.sqrt(cout * 9)
    w1 = jax.random.uniform(ks[0], (cout, cin, 3, 3), jnp.float32, -k1, k1)
    b1 = jax.random.uniform(ks[1], (cout,), jnp.float32, -k1, k1)
    g1 = 1.0 + 0.1 * jax.random.normal(ks[2], (cout,), jnp.float32)
    be1 = 0.1 * jax.random.normal(ks[3], (cout,), jnp.float32)
    m1 = 0.1 * jax.random.normal(ks[4], (cout,), jnp.float32)
    v1 = 0.8 + 0.4 * jax.random.uniform(ks[5], (cout,), jnp.float32)
    w2 = jax.random.uniform(ks[6], (cout, cout, 3, 3), jnp.float32, -k2, k2)
    b2 = jax.random.uniform(ks[7], (cout,), jnp.float32, -k2, k2)
    g2 = 1.0 + 0.1 * jax.random.normal(ks[8], (cout,), jnp.float32)
    be2 = 0.1 * jax.random.normal(ks[9], (cout,), jnp.float32)
    m2 = 0.1 * jax.random.normal(ks[10], (cout,), jnp.float32)
    v2 = 0.8 + 0.4 * jax.random.uniform(ks[11], (cout,), jnp.float32)
    return (w1, b1, g1, be1, m1, v1, w2, b2, g2, be2, m2, v2)


if __name__ == "__main__":
    key = jax.random.PRNGKey(0)
    kx1, kp1, kx2, kp2 = jax.random.split(key, 4)

    configs = [
        # (in_channels, out_channels, is_res, x_key, param_key)
        (4, 8, True,  kx1, kp1),   # residual, channel change  -> out = x1 + x2
        (8, 8, True,  kx2, kp2),   # residual, same channels   -> out = x  + x2
        (4, 8, False, kx1, kp1),   # plain conv1 -> conv2 path -> out = x2
    ]

    for cin, cout, is_res, kx, kp in configs:
        x = jax.random.normal(kx, (2, cin, 16, 16), dtype=jnp.float32)
        params = _make_params(kp, cin, cout)

        out = residual_conv_block(x, params, is_res=is_res)
        out = jax.block_until_ready(out)
        ref = _reference(x, params, is_res=is_res)

        assert out.shape == ref.shape == (2, cout, 16, 16)
        assert jnp.allclose(out, ref, atol=1e-3, rtol=1e-3), (
            f"mismatch cin={cin} cout={cout} is_res={is_res}: "
            f"max abs err {jnp.max(jnp.abs(out - ref))}")

    print("KERNEL_OK")
</pallas_src>

<mosaic_0001>
module attributes {stable_mosaic.version = 11 : i64} {
  func.func @_res_conv_block_kernel(%arg0: i32, %arg1: memref<1x8x290xf32, #tpu.memory_space<vmem>>, %arg2: memref<8x72xf32, #tpu.memory_space<vmem>>, %arg3: memref<8x1xf32, #tpu.memory_space<vmem>>, %arg4: memref<8x72xf32, #tpu.memory_space<vmem>>, %arg5: memref<8x1xf32, #tpu.memory_space<vmem>>, %arg6: memref<1x8x256xf32, #tpu.memory_space<vmem>>, %arg7: memref<8x290xf32, #tpu.memory_space<vmem>>) attributes {dimension_semantics = [#tpu.dimension_semantics<parallel>], iteration_bounds = array<i64: 2>, scalar_prefetch = 0 : i64, scratch_operands = 1 : i64, tpu.core_type = #tpu.core_type<tc>, window_params = [{transform_indices = @transform_0, window_bounds = array<i64: 1, 8, 290>}, {pipeline_mode = #tpu.pipeline_mode<synchronous>, transform_indices = @transform_1, window_bounds = array<i64: 8, 72>}, {pipeline_mode = #tpu.pipeline_mode<synchronous>, transform_indices = @transform_2, window_bounds = array<i64: 8, 1>}, {pipeline_mode = #tpu.pipeline_mode<synchronous>, transform_indices = @transform_3, window_bounds = array<i64: 8, 72>}, {pipeline_mode = #tpu.pipeline_mode<synchronous>, transform_indices = @transform_4, window_bounds = array<i64: 8, 1>}, {transform_indices = @transform_5, window_bounds = array<i64: 1, 8, 256>}]} {
    %0 = tpu.iota {dimensions = array<i32: 1>} : vector<1x256xi32>
    %c15_i32 = arith.constant 15 : i32
    %1 = vector.broadcast %c15_i32 : i32 to vector<1x256xi32>
    %2 = arith.andi %0, %1 : vector<1x256xi32>
    %c1_i32 = arith.constant 1 : i32
    %3 = vector.broadcast %c1_i32 : i32 to vector<1x256xi32>
    %4 = arith.cmpi sge, %2, %3 : vector<1x256xi32>
    %c14_i32 = arith.constant 14 : i32
    %5 = vector.broadcast %c14_i32 : i32 to vector<1x256xi32>
    %6 = arith.cmpi sle, %2, %5 : vector<1x256xi32>
    %c0 = arith.constant 0 : index
    %c0_0 = arith.constant 0 : index
    %7 = vector.load %arg2[%c0, %c0_0] : memref<8x72xf32, #tpu.memory_space<vmem>>, vector<8x72xf32>
    %c0_1 = arith.constant 0 : index
    %c0_2 = arith.constant 0 : index
    %8 = vector.load %arg3[%c0_1, %c0_2] : memref<8x1xf32, #tpu.memory_space<vmem>>, vector<8x1xf32>
    %c0_3 = arith.constant 0 : index
    %c0_4 = arith.constant 0 : index
    %c0_5 = arith.constant 0 : index
    %9 = vector.load %arg1[%c0_3, %c0_4, %c0_5] : memref<1x8x290xf32, #tpu.memory_space<vmem>>, vector<1x8x256xf32>
    %10 = vector.shape_cast %9 : vector<1x8x256xf32> to vector<8x256xf32>
    %cst = arith.constant 0.000000e+00 : f32
    %11 = vector.shape_cast %4 : vector<1x256xi1> to vector<1x256xi1>
    %12 = vector.broadcast %11 : vector<1x256xi1> to vector<8x256xi1>
    %13 = vector.broadcast %cst : f32 to vector<8x256xf32>
    %14 = arith.select %12, %10, %13 : vector<8x256xi1>, vector<8x256xf32>
    %c0_6 = arith.constant 0 : index
    %c0_7 = arith.constant 0 : index
    %c1 = arith.constant 1 : index
    %15 = vector.load %arg1[%c0_6, %c0_7, %c1] : memref<1x8x290xf32, #tpu.memory_space<vmem>>, vector<1x8x256xf32>
    %16 = vector.shape_cast %15 : vector<1x8x256xf32> to vector<8x256xf32>
    %c0_8 = arith.constant 0 : index
    %c0_9 = arith.constant 0 : index
    %c2 = arith.constant 2 : index
    %17 = vector.load %arg1[%c0_8, %c0_9, %c2] : memref<1x8x290xf32, #tpu.memory_space<vmem>>, vector<1x8x256xf32>
    %18 = vector.shape_cast %17 : vector<1x8x256xf32> to vector<8x256xf32>
    %cst_10 = arith.constant 0.000000e+00 : f32
    %19 = vector.shape_cast %6 : vector<1x256xi1> to vector<1x256xi1>
    %20 = vector.broadcast %19 : vector<1x256xi1> to vector<8x256xi1>
    %21 = vector.broadcast %cst_10 : f32 to vector<8x256xf32>
    %22 = arith.select %20, %18, %21 : vector<8x256xi1>, vector<8x256xf32>
    %c0_11 = arith.constant 0 : index
    %c0_12 = arith.constant 0 : index
    %c16 = arith.constant 16 : index
    %23 = vector.load %arg1[%c0_11, %c0_12, %c16] : memref<1x8x290xf32, #tpu.memory_space<vmem>>, vector<1x8x256xf32>
    %24 = vector.shape_cast %23 : vector<1x8x256xf32> to vector<8x256xf32>
    %cst_13 = arith.constant 0.000000e+00 : f32
    %25 = vector.shape_cast %4 : vector<1x256xi1> to vector<1x256xi1>
    %26 = vector.broadcast %25 : vector<1x256xi1> to vector<8x256xi1>
    %27 = vector.broadcast %cst_13 : f32 to vector<8x256xf32>
    %28 = arith.select %26, %24, %27 : vector<8x256xi1>, vector<8x256xf32>
    %c0_14 = arith.constant 0 : index
    %c0_15 = arith.constant 0 : index
    %c17 = arith.constant 17 : index
    %29 = vector.load %arg1[%c0_14, %c0_15, %c17] : memref<1x8x290xf32, #tpu.memory_space<vmem>>, vector<1x8x256xf32>
    %30 = vector.shape_cast %29 : vector<1x8x256xf32> to vector<8x256xf32>
    %c0_16 = arith.constant 0 : index
    %c0_17 = arith.constant 0 : index
    %c18 = arith.constant 18 : index
    %31 = vector.load %arg1[%c0_16, %c0_17, %c18] : memref<1x8x290xf32, #tpu.memory_space<vmem>>, vector<1x8x256xf32>
    %32 = vector.shape_cast %31 : vector<1x8x256xf32> to vector<8x256xf32>
    %cst_18 = arith.constant 0.000000e+00 : f32
    %33 = vector.shape_cast %6 : vector<1x256xi1> to vector<1x256xi1>
    %34 = vector.broadcast %33 : vector<1x256xi1> to vector<8x256xi1>
    %35 = vector.broadcast %cst_18 : f32 to vector<8x256xf32>
    %36 = arith.select %34, %32, %35 : vector<8x256xi1>, vector<8x256xf32>
    %c0_19 = arith.constant 0 : index
    %c0_20 = arith.constant 0 : index
    %c32 = arith.constant 32 : index
    %37 = vector.load %arg1[%c0_19, %c0_20, %c32] : memref<1x8x290xf32, #tpu.memory_space<vmem>>, vector<1x8x256xf32>
    %38 = vector.shape_cast %37 : vector<1x8x256xf32> to vector<8x256xf32>
    %cst_21 = arith.constant 0.000000e+00 : f32
    %39 = vector.shape_cast %4 : vector<1x256xi1> to vector<1x256xi1>
    %40 = vector.broadcast %39 : vector<1x256xi1> to vector<8x256xi1>
    %41 = vector.broadcast %cst_21 : f32 to vector<8x256xf32>
    %42 = arith.select %40, %38, %41 : vector<8x256xi1>, vector<8x256xf32>
    %c0_22 = arith.constant 0 : index
    %c0_23 = arith.constant 0 : index
    %c33 = arith.constant 33 : index
    %43 = vector.load %arg1[%c0_22, %c0_23, %c33] : memref<1x8x290xf32, #tpu.memory_space<vmem>>, vector<1x8x256xf32>
    %44 = vector.shape_cast %43 : vector<1x8x256xf32> to vector<8x256xf32>
    %c0_24 = arith.constant 0 : index
    %c0_25 = arith.constant 0 : index
    %c34 = arith.constant 34 : index
    %45 = vector.load %arg1[%c0_24, %c0_25, %c34] : memref<1x8x290xf32, #tpu.memory_space<vmem>>, vector<1x8x256xf32>
    %46 = vector.shape_cast %45 : vector<1x8x256xf32> to vector<8x256xf32>
    %cst_26 = arith.constant 0.000000e+00 : f32
    %47 = vector.shape_cast %6 : vector<1x256xi1> to vector<1x256xi1>
    %48 = vector.broadcast %47 : vector<1x256xi1> to vector<8x256xi1>
    %49 = vector.broadcast %cst_26 : f32 to vector<8x256xf32>
    %50 = arith.select %48, %46, %49 : vector<8x256xi1>, vector<8x256xf32>
    %51 = tpu.concatenate %14, %16, %22, %28, %30, %36, %42, %44, %50 in 0 : vector<8x256xf32>, vector<8x256xf32>, vector<8x256xf32>, vector<8x256xf32>, vector<8x256xf32>, vector<8x256xf32>, vector<8x256xf32>, vector<8x256xf32>, vector<8x256xf32> -> vector<72x256xf32>
    %cst_27 = arith.constant dense<0.000000e+00> : vector<8x256xf32>
    %52 = tpu.matmul %7, %51, %cst_27 {dimension_numbers = #tpu.dot_dimension_numbers<[1], [0], [0], [1], [0, 0, 1, 1], [], []>} : vector<8x72xf32>, vector<72x256xf32>, vector<8x256xf32> -> vector<8x256xf32>
    %53 = vector.broadcast %8 : vector<8x1xf32> to vector<8x256xf32>
    %54 = arith.addf %52, %53 : vector<8x256xf32>
    %cst_28 = arith.constant 5.000000e-01 : f32
    %55 = vector.broadcast %cst_28 : f32 to vector<8x256xf32>
    %56 = arith.mulf %55, %54 : vector<8x256xf32>
    %cst_29 = arith.constant 0.707106769 : f32
    %57 = vector.broadcast %cst_29 : f32 to vector<8x256xf32>
    %58 = arith.mulf %54, %57 : vector<8x256xf32>
    %59 = math.erf %58 : vector<8x256xf32>
    %cst_30 = arith.constant 1.000000e+00 : f32
    %60 = vector.broadcast %cst_30 : f32 to vector<8x256xf32>
    %61 = arith.addf %60, %59 : vector<8x256xf32>
    %62 = arith.mulf %56, %61 : vector<8x256xf32>
    %cst_31 = arith.constant 0.000000e+00 : f32
    %63 = vector.broadcast %cst_31 : f32 to vector<8x17xf32>
    %c0_32 = arith.constant 0 : index
    %c0_33 = arith.constant 0 : index
    %64 = vector.load %arg7[%c0_32, %c0_33] : memref<8x290xf32, #tpu.memory_space<vmem>>, vector<8x17xf32>
    tpu.vector_store %arg7[%c0_32, %c0_33], %63 {strides = array<i32>} : memref<8x290xf32, #tpu.memory_space<vmem>>, vector<8x17xf32>,
    %c0_34 = arith.constant 0 : index
    %c273 = arith.constant 273 : index
    %65 = vector.load %arg7[%c0_34, %c273] : memref<8x290xf32, #tpu.memory_space<vmem>>, vector<8x17xf32>
    tpu.vector_store %arg7[%c0_34, %c273], %63 {strides = array<i32>} : memref<8x290xf32, #tpu.memory_space<vmem>>, vector<8x17xf32>,
    %c0_35 = arith.constant 0 : index
    %c17_36 = arith.constant 17 : index
    %66 = vector.load %arg7[%c0_35, %c17_36] : memref<8x290xf32, #tpu.memory_space<vmem>>, vector<8x256xf32>
    tpu.vector_store %arg7[%c0_35, %c17_36], %62 {strides = array<i32>} : memref<8x290xf32, #tpu.memory_space<vmem>>, vector<8x256xf32>,
    %c0_37 = arith.constant 0 : index
    %c0_38 = arith.constant 0 : index
    %67 = vector.load %arg4[%c0_37, %c0_38] : memref<8x72xf32, #tpu.memory_space<vmem>>, vector<8x72xf32>
    %c0_39 = arith.constant 0 : index
    %c0_40 = arith.constant 0 : index
    %68 = vector.load %arg5[%c0_39, %c0_40] : memref<8x1xf32, #tpu.memory_space<vmem>>, vector<8x1xf32>
    %c0_41 = arith.constant 0 : index
    %c0_42 = arith.constant 0 : index
    %69 = vector.load %arg7[%c0_41, %c0_42] : memref<8x290xf32, #tpu.memory_space<vmem>>, vector<8x256xf32>
    %cst_43 = arith.constant 0.000000e+00 : f32
    %70 = vector.shape_cast %4 : vector<1x256xi1> to vector<1x256xi1>
    %71 = vector.broadcast %70 : vector<1x256xi1> to vector<8x256xi1>
    %72 = vector.broadcast %cst_43 : f32 to vector<8x256xf32>
    %73 = arith.select %71, %69, %72 : vector<8x256xi1>, vector<8x256xf32>
    %c0_44 = arith.constant 0 : index
    %c1_45 = arith.constant 1 : index
    %74 = vector.load %arg7[%c0_44, %c1_45] : memref<8x290xf32, #tpu.memory_space<vmem>>, vector<8x256xf32>
    %c0_46 = arith.constant 0 : index
    %c2_47 = arith.constant 2 : index
    %75 = vector.load %arg7[%c0_46, %c2_47] : memref<8x290xf32, #tpu.memory_space<vmem>>, vector<8x256xf32>
    %cst_48 = arith.constant 0.000000e+00 : f32
    %76 = vector.shape_cast %6 : vector<1x256xi1> to vector<1x256xi1>
    %77 = vector.broadcast %76 : vector<1x256xi1> to vector<8x256xi1>
    %78 = vector.broadcast %cst_48 : f32 to vector<8x256xf32>
    %79 = arith.select %77, %75, %78 : vector<8x256xi1>, vector<8x256xf32>
    %c0_49 = arith.constant 0 : index
    %c16_50 = arith.constant 16 : index
    %80 = vector.load %arg7[%c0_49, %c16_50] : memref<8x290xf32, #tpu.memory_space<vmem>>, vector<8x256xf32>
    %cst_51 = arith.constant 0.000000e+00 : f32
    %81 = vector.shape_cast %4 : vector<1x256xi1> to vector<1x256xi1>
    %82 = vector.broadcast %81 : vector<1x256xi1> to vector<8x256xi1>
    %83 = vector.broadcast %cst_51 : f32 to vector<8x256xf32>
    %84 = arith.select %82, %80, %83 : vector<8x256xi1>, vector<8x256xf32>
    %c0_52 = arith.constant 0 : index
    %c17_53 = arith.constant 17 : index
    %85 = vector.load %arg7[%c0_52, %c17_53] : memref<8x290xf32, #tpu.memory_space<vmem>>, vector<8x256xf32>
    %c0_54 = arith.constant 0 : index
    %c18_55 = arith.constant 18 : index
    %86 = vector.load %arg7[%c0_54, %c18_55] : memref<8x290xf32, #tpu.memory_space<vmem>>, vector<8x256xf32>
    %cst_56 = arith.constant 0.000000e+00 : f32
    %87 = vector.shape_cast %6 : vector<1x256xi1> to vector<1x256xi1>
    %88 = vector.broadcast %87 : vector<1x256xi1> to vector<8x256xi1>
    %89 = vector.broadcast %cst_56 : f32 to vector<8x256xf32>
    %90 = arith.select %88, %86, %89 : vector<8x256xi1>, vector<8x256xf32>
    %c0_57 = arith.constant 0 : index
    %c32_58 = arith.constant 32 : index
    %91 = vector.load %arg7[%c0_57, %c32_58] : memref<8x290xf32, #tpu.memory_space<vmem>>, vector<8x256xf32>
    %cst_59 = arith.constant 0.000000e+00 : f32
    %92 = vector.shape_cast %4 : vector<1x256xi1> to vector<1x256xi1>
    %93 = vector.broadcast %92 : vector<1x256xi1> to vector<8x256xi1>
    %94 = vector.broadcast %cst_59 : f32 to vector<8x256xf32>
    %95 = arith.select %93, %91, %94 : vector<8x256xi1>, vector<8x256xf32>
    %c0_60 = arith.constant 0 : index
    %c33_61 = arith.constant 33 : index
    %96 = vector.load %arg7[%c0_60, %c33_61] : memref<8x290xf32, #tpu.memory_space<vmem>>, vector<8x256xf32>
    %c0_62 = arith.constant 0 : index
    %c34_63 = arith.constant 34 : index
    %97 = vector.load %arg7[%c0_62, %c34_63] : memref<8x290xf32, #tpu.memory_space<vmem>>, vector<8x256xf32>
    %cst_64 = arith.constant 0.000000e+00 : f32
    %98 = vector.shape_cast %6 : vector<1x256xi1> to vector<1x256xi1>
    %99 = vector.broadcast %98 : vector<1x256xi1> to vector<8x256xi1>
    %100 = vector.broadcast %cst_64 : f32 to vector<8x256xf32>
    %101 = arith.select %99, %97, %100 : vector<8x256xi1>, vector<8x256xf32>
    %102 = tpu.concatenate %73, %74, %79, %84, %85, %90, %95, %96, %101 in 0 : vector<8x256xf32>, vector<8x256xf32>, vector<8x256xf32>, vector<8x256xf32>, vector<8x256xf32>, vector<8x256xf32>, vector<8x256xf32>, vector<8x256xf32>, vector<8x256xf32> -> vector<72x256xf32>
    %cst_65 = arith.constant dense<0.000000e+00> : vector<8x256xf32>
    %103 = tpu.matmul %67, %102, %cst_65 {dimension_numbers = #tpu.dot_dimension_numbers<[1], [0], [0], [1], [0, 0, 1, 1], [], []>} : vector<8x72xf32>, vector<72x256xf32>, vector<8x256xf32> -> vector<8x256xf32>
    %104 = vector.broadcast %68 : vector<8x1xf32> to vector<8x256xf32>
    %105 = arith.addf %103, %104 : vector<8x256xf32>
    %cst_66 = arith.constant 5.000000e-01 : f32
    %106 = vector.broadcast %cst_66 : f32 to vector<8x256xf32>
    %107 = arith.mulf %106, %105 : vector<8x256xf32>
    %cst_67 = arith.constant 0.707106769 : f32
    %108 = vector.broadcast %cst_67 : f32 to vector<8x256xf32>
    %109 = arith.mulf %105, %108 : vector<8x256xf32>
    %110 = math.erf %109 : vector<8x256xf32>
    %cst_68 = arith.constant 1.000000e+00 : f32
    %111 = vector.broadcast %cst_68 : f32 to vector<8x256xf32>
    %112 = arith.addf %111, %110 : vector<8x256xf32>
    %113 = arith.mulf %107, %112 : vector<8x256xf32>
    %114 = arith.addf %62, %113 : vector<8x256xf32>
    %c0_69 = arith.constant 0 : index
    %c0_70 = arith.constant 0 : index
    %c0_71 = arith.constant 0 : index
    %115 = vector.load %arg6[%c0_69, %c0_70, %c0_71] : memref<1x8x256xf32, #tpu.memory_space<vmem>>, vector<1x8x256xf32>
    %116 = vector.shape_cast %115 : vector<1x8x256xf32> to vector<8x256xf32>
    %117 = vector.shape_cast %114 : vector<8x256xf32> to vector<1x8x256xf32>
    tpu.vector_store %arg6[%c0_69, %c0_70, %c0_71], %117 {strides = array<i32>} : memref<1x8x256xf32, #tpu.memory_space<vmem>>, vector<1x8x256xf32>,
    return
  }
  func.func @transform_0(%arg0: i32) -> (i32, i32, i32) {
    %c0_i32 = arith.constant 0 : i32
    %c0_i32_0 = arith.constant 0 : i32
    %c0_i32_1 = arith.constant 0 : i32
    return %arg0, %c0_i32, %c0_i32_0 : i32, i32, i32
  }
  func.func @transform_1(%arg0: i32) -> (i32, i32) {
    %c0_i32 = arith.constant 0 : i32
    %c0_i32_0 = arith.constant 0 : i32
    %c0_i32_1 = arith.constant 0 : i32
    return %c0_i32, %c0_i32_0 : i32, i32
  }
  func.func @transform_2(%arg0: i32) -> (i32, i32) {
    %c0_i32 = arith.constant 0 : i32
    %c0_i32_0 = arith.constant 0 : i32
    %c0_i32_1 = arith.constant 0 : i32
    return %c0_i32, %c0_i32_0 : i32, i32
  }
  func.func @transform_3(%arg0: i32) -> (i32, i32) {
    %c0_i32 = arith.constant 0 : i32
    %c0_i32_0 = arith.constant 0 : i32
    %c0_i32_1 = arith.constant 0 : i32
    return %c0_i32, %c0_i32_0 : i32, i32
  }
  func.func @transform_4(%arg0: i32) -> (i32, i32) {
    %c0_i32 = arith.constant 0 : i32
    %c0_i32_0 = arith.constant 0 : i32
    %c0_i32_1 = arith.constant 0 : i32
    return %c0_i32, %c0_i32_0 : i32, i32
  }
  func.func @transform_5(%arg0: i32) -> (i32, i32, i32) {
    %c0_i32 = arith.constant 0 : i32
    %c0_i32_0 = arith.constant 0 : i32
    %c0_i32_1 = arith.constant 0 : i32
    return %arg0, %c0_i32, %c0_i32_0 : i32, i32, i32
  }
}

</mosaic_0001>

<bundles_post_ra>
// kernel: residual_conv_block.1
= control target key start
LH: loop header
LB: loop body
LE: loop exit
PB: predicated region body
PF: predicated region fallthrough
CT: control target
= control target key end

     0   :  { %s952_s18 = smov 0   ;;  %s1210_s0 = inlined_call_operand.vmem [shape: f32[2,8,290], index: 0, kind: input, shape index: {}]   ;;  %s1211_s1 = inlined_call_operand.vmem [shape: f32[8,72], index: 1, kind: input, shape index: {}]   ;;  %s1212_s2 = inlined_call_operand.vmem [shape: f32[8,1], index: 2, kind: input, shape index: {}]   ;;  %s1213_s3 = inlined_call_operand.vmem [shape: f32[8,72], index: 3, kind: input, shape index: {}]   ;;  %s1214_s4 = inlined_call_operand.vmem [shape: f32[8,1], index: 4, kind: input, shape index: {}]   ;;  %s1215_s5 = inlined_call_operand.vmem [shape: f32[2,8,256], index: 5, kind: output, shape index: {}]  }
   0x1 LB: > { %s800_s19 = sadd.s32 4294967295, %s909_s18   ;;  %p804_p0 = scmp.ge.s32.totalorder %s909_s18, 1  ;;  %s909_s18 = sphi %s952_s18, %s15_s18  }
   0x2   : > { %p187_p1 = scmp.lt.s32.totalorder %s909_s18, 3 }
   0x4   : > { %p188_p2 = pnand %p804_p0, %p187_p1 }
   0x5   : > { %p215_p3 = scmp.lt.s32.totalorder (!%p188_p2), %s800_s19, 1  ;;  %s911_s24 = smov (!%p188_p2), 94  }
   0x6   : > { %191 = sbr.rel (%p188_p2) target bundleno = 847 (0x34f), region = 40  ;;  %s912_s25 = smov (!%p188_p2), 95  }
   0x7   : > { %s913_s26 = smov (!%p188_p2), 96   ;;  %s914_s27 = smov (!%p188_p2), 110  }
   0x8   : > { %s915_s28 = smov (!%p188_p2), 111   ;;  %s916_s29 = smov (!%p188_p2), 112  }
   0x9   : > { %s917_s30 = smov (!%p188_p2), 126   ;;  %s918_s6 = smov (!%p188_p2), 127  }
   0xa   : > { %s921_s11 = smov (!%p188_p2), 17  }
   0xb   : > { %s1243_s19 = smov (!%p215_p3, %s800_s19), 1  ;;  %v225_v5 = vlaneseq  ;;  %vm310_vm0 = vcmask 769024   ;;  %vm345_vm3 = vcmask 777216   ;;  %vm297_vm4 = vcmask 785408   ;;  %v235_v33 = vld [vmem:[%s1212_s2] sm:$0xff] }
   0xc   : > { %s843_s20 = smul.u32 24, %s1243_s19  ;;  %vm1221_vm7 = vcmask 900096   ;;  %vm1220_vm8 = vcmask 908288   ;;  %v919_v36 = vmov 0   ;;  %vm1219_vm9 = vcmask 916480   ;;  %v234_v58 = vld [vmem:[%s1211_s1] sm:$0xff] }
   0xd   : > { %v226_v6 = vand.u32 127, %v225_v5  ;;  %878 = vset.pattern.permute.xlu0 %v919_v36  ;;  %894 = vset.pattern.permute.xlu1 %v919_v36  ;;  %vm1218_vm10 = vcmask 1031168   ;;  %vm1217_vm11 = vcmask 1039360   ;;  %vm1216_vm12 = vcmask 588800   ;;  %s842_s16 = sshll.u32 %s1243_s19, 4 }
   0xe   : > { %s219_s23 = scalar_lea.vmem %s1210_s0, %s843_s20  ;;  %vm489_vm13 = vcmask 277640   ;;  %vm487_vm14 = vcmask 138240   ;;  %s224_s21 = scalar_lea.vmem %s1215_s5, %s842_s16 }
   0xf   : > { %v244_v0 = vld [vmem:[%s219_s23 + $0x10] sm:$0xff]  ;;  %v966_v1 = vld [vmem:[%s219_s23] sm:$0xff]  ;;  %v971_v2 = vld [vmem:[%s219_s23 + $0x8] sm:$0xff]  ;;  %v227_v8 = vadd.s32 128, %v226_v6  ;;  %v228_v11 = vand.u32 15, %v226_v6 }
  0x10   : > { %308 = vrot.lane.b32.xlu1 %v244_v0, %s911_s24  ;;  %304 = vrot.lane.b32.xlu0 %v966_v1, %s911_s24  ;;  %v863_v3 = vpack.i.bf16 %v971_v2, %v966_v1 }
  0x11   : > { %343 = vrot.lane.b32.xlu2 %v244_v0, %s912_s25  ;;  %v229_v12 = vand.u32 15, %v227_v8  ;;  %vm1003_vm1 = vcmp.le.s32.totalorder %v228_v11, 14  ;;  %vm1019_vm5 = vcmp.ge.s32.totalorder %v228_v11, 1 }
  0x13   : > { %vm1007_vm2 = vcmp.le.s32.totalorder %v229_v12, 14  ;;  %vm1023_vm6 = vcmp.ge.s32.totalorder %v229_v12, 1 }
  0x18   : > { %864 = vrot.lane.b32.xlu1 %v863_v3, %s912_s25  ;;  %306 = vrot.lane.b32.xlu0 %v971_v2, %s911_s24 }
  0x19   : > { %291 = vrot.lane.b32.xlu2 %v966_v1, %s913_s26 }
  0x20   : > { %295 = vrot.lane.b32.xlu1 %v244_v0, %s913_s26  ;;  %293 = vrot.lane.b32.xlu0 %v971_v2, %s913_s26 }
  0x21   : > { %278 = vrot.lane.b32.xlu2 %v966_v1, %s914_s27 }
  0x28   : > { %282 = vrot.lane.b32.xlu1 %v244_v0, %s914_s27  ;;  %280 = vrot.lane.b32.xlu0 %v971_v2, %s914_s27 }
  0x29   : > { %869 = vrot.lane.b32.xlu2 %v863_v3, %s915_s28 }
  0x30   : > { %265 = vrot.lane.b32.xlu1 %v966_v1, %s916_s29  ;;  %332 = vrot.lane.b32.xlu0 %v244_v0, %s915_s28 }
  0x31   : > { %267 = vrot.lane.b32.xlu2 %v971_v2, %s916_s29 }
  0x38   : > { %252 = vrot.lane.b32.xlu1 %v966_v1, %s917_s30  ;;  %269 = vrot.lane.b32.xlu0 %v244_v0, %s916_s29 }
  0x39   : > { %254 = vrot.lane.b32.xlu2 %v971_v2, %s917_s30 }
  0x40   : > { %874 = vrot.lane.b32.xlu1 %v863_v3, %s918_s6  ;;  %256 = vrot.lane.b32.xlu0 %v244_v0, %s917_s30 }
  0x41   : > { %321 = vrot.lane.b32.xlu2 %v244_v0, %s918_s6 }
  0x48   : > { %352 = vperm.xlu0 %878, %v235_v33  }
  0x6b   : > { %v344_v4 = vpop.permute.xlu2 %343 }
  0x73   : > { %v292_v7 = vpop.permute.xlu2 %291 }
  0x7b   : > { %v279_v15 = vpop.permute.xlu2 %278 }
  0x82   : > { %v309_v9 = vpop.permute.xlu1 %308  ;;  %v305_v10 = vpop.permute.xlu0 %304 }
  0x83   : > { %v870_v30 = vpop.permute.xlu2 %869 }
  0x84   : > { %v872_v31 = vunpack.i.h.bf16 %v870_v30  ;;  %v871_v32 = vunpack.i.l.bf16 %v870_v30 }
  0x86   : > { %v335_v39 = vsel %vm1220_vm8, %v871_v32, %v872_v31 }
  0x8a   : > { %v865_v16 = vpop.permute.xlu1 %864  ;;  %v307_v17 = vpop.permute.xlu0 %306 }
  0x8b   : > { %v867_v18 = vunpack.i.h.bf16 %v865_v16  ;;  %v866_v19 = vunpack.i.l.bf16 %v865_v16  ;;  %v311_v20 = vsel %vm310_vm0, %v305_v10, %v307_v17  ;;  %v312_v21 = vsel %vm310_vm0, %v307_v17, %v309_v9  ;;  %v268_v40 = vpop.permute.xlu2 %267 }
  0x8c   : > { %808 = vmatpush.msk.msra.mxu0 %vm1003_vm1, %v311_v20  ;;  %815 = vmatpush.msk.msra.mxu1 %vm1007_vm2, %v312_v21 }
  0x8d   : > { %v346_v22 = vsel %vm345_vm3, %v866_v19, %v867_v18  ;;  %v347_v23 = vsel %vm345_vm3, %v867_v18, %v344_v4 }
  0x8e   : > { %367 = vmatpush.msra.mxu0 %v346_v22  ;;  %387 = vmatpush.msra.mxu1 %v347_v23 }
  0x92   : > { %v296_v26 = vpop.permute.xlu1 %295  ;;  %v294_v27 = vpop.permute.xlu0 %293 }
  0x93   : > { %v298_v28 = vsel %vm297_vm4, %v292_v7, %v294_v27  ;;  %v299_v29 = vsel %vm297_vm4, %v294_v27, %v296_v26  ;;  %v255_v45 = vpop.permute.xlu2 %254 }
  0x94   : > { %809 = vmatpush.msk.msra.mxu0 %vm1019_vm5, %v298_v28  ;;  %816 = vmatpush.msk.msra.mxu1 %vm1023_vm6, %v299_v29 }
  0x9a   : > { %v283_v34 = vpop.permute.xlu1 %282  ;;  %v281_v35 = vpop.permute.xlu0 %280 }
  0x9b   : > { %v285_v37 = vsel %vm1221_vm7, %v279_v15, %v281_v35  ;;  %v286_v38 = vsel %vm1221_vm7, %v281_v35, %v283_v34  ;;  %v322_v50 = vpop.permute.xlu2 %321 }
  0x9c   : > { %810 = vmatpush.msk.msra.mxu0 %vm1003_vm1, %v285_v37  ;;  %817 = vmatpush.msk.msra.mxu1 %vm1007_vm2, %v286_v38 }
  0x9e   : > { %370 = vmatpush.msra.mxu0 %v335_v39  ;;  %v920_v39 = vmov 0.0  }
  0x9f   : > { %490 = vst.msk [vmem:[#allocation2 + $0x10] sm:$0xff] %vm489_vm13, %v920_v39 }
  0xa0   : > { %488 = vst.msk [vmem:[#allocation2] sm:$0xff] %vm487_vm14, %v920_v39 }
  0xa2   : > { %v266_v41 = vpop.permute.xlu1 %265  ;;  %v333_v42 = vpop.permute.xlu0 %332 }
  0xa3   : > { %v272_v43 = vsel %vm1219_vm9, %v266_v41, %v268_v40  ;;  %v336_v44 = vsel %vm1220_vm8, %v872_v31, %v333_v42 }
  0xa4   : > { %811 = vmatpush.msk.msra.mxu0 %vm1019_vm5, %v272_v43  ;;  %390 = vmatpush.msra.mxu1 %v336_v44 }
  0xaa   : > { %v253_v46 = vpop.permute.xlu1 %252  ;;  %v270_v47 = vpop.permute.xlu0 %269 }
  0xab   : > { %v259_v48 = vsel %vm1218_vm10, %v253_v46, %v255_v45  ;;  %v273_v49 = vsel %vm1219_vm9, %v268_v40, %v270_v47 }
  0xac   : > { %812 = vmatpush.msk.msra.mxu0 %vm1003_vm1, %v259_v48  ;;  %818 = vmatpush.msk.msra.mxu1 %vm1023_vm6, %v273_v49 }
  0xb2   : > { %v875_v51 = vpop.permute.xlu1 %874  ;;  %v257_v52 = vpop.permute.xlu0 %256 }
  0xb3   : > { %v877_v53 = vunpack.i.h.bf16 %v875_v51  ;;  %v876_v54 = vunpack.i.l.bf16 %v875_v51  ;;  %v260_v55 = vsel %vm1218_vm10, %v255_v45, %v257_v52 }
  0xb4   : > { %819 = vmatpush.msk.msra.mxu1 %vm1007_vm2, %v260_v55 }
  0xb5   : > { %v324_v56 = vsel %vm1217_vm11, %v876_v54, %v877_v53  ;;  %v325_v57 = vsel %vm1217_vm11, %v877_v53, %v322_v50 }
  0xb6   : > { %373 = vmatpush.msra.mxu0 %v324_v56  ;;  %393 = vmatpush.msra.mxu1 %v325_v57 }
  0xb8   : > { %813 = vmatpush.msk.msra.mxu0 %vm1019_vm5, %v966_v1  ;;  %820 = vmatpush.msk.msra.mxu1 %vm1023_vm6, %v971_v2 }
  0xb9   : > { %814 = vmatmul.msk.f32.vlgmr.msra.gmra.mxu0 %vm1216_vm12, %v234_v58  ;;  %821 = vmatmul.msk.f32.vlgmr.msra.gmra.mxu1 %vm1216_vm12, %v234_v58 }
  0xba   : > { %v353_v59 = vpop.permute.xlu0 %352 }
 0x136   : > { %v376_v60 = vpop.f32.mrf.mxu0  ;;  %v396_v61 = vpop.f32.mrf.mxu1 }
 0x137   : > { %v1069_v62 = vadd.f32 %v376_v60, %v353_v59  ;;  %v1071_v63 = vadd.f32 %v396_v61, %v353_v59 }
 0x139   : > { %v1074_v0 = vmul.f32 0.70710677, %v1069_v62  ;;  %v1077_v1 = vmul.f32 0.70710677, %v1071_v63 }
 0x13b   : > { %v403_v2 = vmul.f32 %v1074_v0, %v1074_v0  ;;  %v443_v3 = vmul.f32 %v1077_v1, %v1077_v1 }
 0x13d   : > { %v404_v4 = vmin.f32 %v403_v2, 16.0  ;;  %v444_v5 = vmin.f32 %v443_v3, 16.0 }
 0x13f   : > { %v405_v6 = vmul.f32 2.1237322e-06, %v404_v4  ;;  %v445_v7 = vmul.f32 2.1237322e-06, %v444_v5  ;;  %v456_v8 = vmul.f32 3.8918573e-05, %v444_v5 }
 0x140   : > { %v416_v9 = vmul.f32 3.8918573e-05, %v404_v4 }
 0x141   : > { %v406_v10 = vadd.f32 0.00028619796, %v405_v6  ;;  %v446_v11 = vadd.f32 0.00028619796, %v445_v7  ;;  %v457_v12 = vadd.f32 0.001143296, %v456_v8 }
 0x142   : > { %v417_v15 = vadd.f32 0.001143296, %v416_v9 }
 0x143   : > { %v407_v16 = vmul.f32 %v406_v10, %v404_v4  ;;  %v447_v17 = vmul.f32 %v446_v11, %v444_v5  ;;  %v458_v18 = vmul.f32 %v457_v12, %v444_v5 }
 0x144   : > { %v418_v19 = vmul.f32 %v417_v15, %v404_v4 }
 0x145   : > { %v448_v20 = vadd.f32 0.0036580483, %v447_v17  ;;  %v459_v21 = vadd.f32 0.014752088, %v458_v18  ;;  %v408_v23 = vadd.f32 0.0036580483, %v407_v16 }
 0x146   : > { %v419_v22 = vadd.f32 0.014752088, %v418_v19  ;;  %v400_v19 = vmul.f32 0.5, %v1071_v63 }
 0x147   : > { %v460_v26 = vmul.f32 %v459_v21, %v444_v5  ;;  %v449_v28 = vmul.f32 %v448_v20, %v444_v5  ;;  %v409_v31 = vmul.f32 %v408_v23, %v404_v4  ;;  %v399_v21 = vmul.f32 0.5, %v1069_v62 }
 0x148   : > { %v420_v27 = vmul.f32 %v419_v22, %v404_v4 }
 0x149   : > { %v461_v29 = vadd.f32 0.112945676, %v460_v26  ;;  %v450_v34 = vadd.f32 0.05243302, %v449_v28  ;;  %v410_v37 = vadd.f32 0.05243302, %v409_v31 }
 0x14a   : > { %v421_v30 = vadd.f32 0.112945676, %v420_v27 }
 0x14b   : > { %v462_v32 = vmul.f32 %v461_v29, %v444_v5  ;;  %v451_v41 = vmul.f32 %v450_v34, %v444_v5  ;;  %v411_v44 = vmul.f32 %v410_v37, %v404_v4 }
 0x14c   : > { %v422_v33 = vmul.f32 %v421_v30, %v404_v4 }
 0x14d   : > { %v463_v35 = vadd.f32 0.4994258, %v462_v32  ;;  %v452_v45 = vadd.f32 0.18741608, %v451_v41  ;;  %v412_v46 = vadd.f32 0.18741608, %v411_v44 }
 0x14e   : > { %v423_v36 = vadd.f32 0.4994258, %v422_v33 }
 0x14f   : > { %v464_v38 = vmul.f32 %v463_v35, %v444_v5  ;;  %v453_v48 = vmul.f32 %v452_v45, %v444_v5  ;;  %v413_v51 = vmul.f32 %v412_v46, %v404_v4 }
 0x150   : > { %v424_v40 = vmul.f32 %v423_v36, %v404_v4 }
 0x151   : > { %v465_v42 = vadd.f32 1.0, %v464_v38  ;;  %v454_v54 = vadd.f32 1.1283791, %v453_v48  ;;  %v414_v60 = vadd.f32 1.1283791, %v413_v51 }
 0x152   : > { %v425_v43 = vadd.f32 1.0, %v424_v40 }
 0x153   : > { %895 = vrcp.f32 %v465_v42  ;;  %v477_v55 = vand.u32 2147483648, %v465_v42  ;;  %v475_v58 = vand.u32 2147483647, %v465_v42  ;;  %vm471_vm12 = vweird.f32 %v465_v42 }
 0x154   : > { %897 = vrcp.f32 %v425_v43  ;;  %v437_v59 = vand.u32 2147483648, %v425_v43  ;;  %v435_v2 = vand.u32 2147483647, %v425_v43  ;;  %vm431_vm10 = vweird.f32 %v425_v43 }
 0x155   : > { %v478_v5 = vor.u32 1.1754944e-38, %v477_v55  ;;  %v455_v4 = vmul.f32 %v454_v54, %v1077_v1  ;;  %vm476_vm9 = vcmp.eq.f32.partialorder %v475_v58, 8.507059e+37  ;;  %v415_v9 = vmul.f32 %v414_v60, %v1074_v0 }
 0x156   : > { %v438_v8 = vor.u32 1.1754944e-38, %v437_v59  ;;  %vm436_vm7 = vcmp.eq.f32.partialorder %v435_v2, 8.507059e+37 }
 0x159   : > { %v896_v47 = vpop.eup %895 }
 0x15a   : > { %v898_v49 = vpop.eup %897  ;;  %v467_v50 = vmul.f32 %v896_v47, %v465_v42  ;;  %vm472_vm15 = vweird.f32 %v896_v47 }
 0x15b   : > { %v427_v52 = vmul.f32 %v898_v49, %v425_v43  ;;  %vm432_vm13 = vweird.f32 %v898_v49  ;;  %vm473_vm11 = vmor %vm471_vm12, %vm472_vm15  ;;  %v506_v43 = vld [vmem:[%s1214_s4] sm:$0xff]  ;;  %vm1237_vm12 = vcmask 1039360  }
 0x15c   : > { %v468_v53 = vsub.f32 1.0, %v467_v50  ;;  %vm433_vm8 = vmor %vm431_vm10, %vm432_vm13 }
 0x15d   : > { %v428_v56 = vsub.f32 1.0, %v427_v52  ;;  %vm1239_vm15 = vmmov %vm1237_vm12 }
 0x15e   : > { %v469_v57 = vmul.f32 %v896_v47, %v468_v53 }
 0x15f   : > { %v429_v61 = vmul.f32 %v898_v49, %v428_v56 }
 0x160   : > { %v470_v3 = vadd.f32 %v896_v47, %v469_v57 }
 0x161   : > { %v430_v6 = vadd.f32 %v898_v49, %v429_v61 }
 0x162   : > { %v474_v7 = vsel %vm473_vm11, %v896_v47, %v470_v3  ;;  %vm1236_vm11 = vcmask 1031168  }
 0x163   : > { %v479_v10 = vsel %vm476_vm9, %v478_v5, %v474_v7  ;;  %v434_v11 = vsel %vm433_vm8, %v898_v49, %v430_v6  ;;  %vm1234_vm9 = vcmask 916480  }
 0x164   : > { %v480_v12 = vmul.f32 %v479_v10, %v455_v4  ;;  %v439_v15 = vsel %vm436_vm7, %v438_v8, %v434_v11  ;;  %vm501_vm7 = vcmask 1047688   ;;  %vm1235_vm10 = vmmov %vm1234_vm9 }
 0x165   : > { %v440_v16 = vmul.f32 %v439_v15, %v415_v9 }
 0x166   : > { %v823_v17 = vclamps-f32 %v480_v12, 1.0  ;;  %v505_v12 = vld [vmem:[%s1213_s3] sm:$0xff] }
 0x167   : > { %v822_v18 = vclamps-f32 %v440_v16, 1.0 }
 0x168   : > { %v484_v20 = vadd.f32 1.0, %v823_v17 }
 0x169   : > { %v483_v1 = vadd.f32 1.0, %v822_v18 }
 0x16a   : > { %v1088_v22 = vmul.f32 %v484_v20, %v400_v19 }
 0x16b   : > { %v1090_v23 = vmul.f32 %v483_v1, %v399_v21 }
 0x16c   : > { %495 = vrot.lane.b32.xlu2 %v1088_v22, %s921_s11 }
 0x16d   : > { %493 = vrot.lane.b32.xlu1 %v1090_v23, %s921_s11 }
 0x1c6   : > { %v496_v0 = vpop.permute.xlu2 %495 }
 0x1c7   : > { %504 = vst.msk [vmem:[#allocation2 + $0x10] sm:$0xff] %vm487_vm14, %v496_v0 }
 0x1ce   : > { %v511_v26 = vld [vmem:[#allocation2 + $0x10] sm:$0xff] }
 0x1cf   : > { %599 = vrot.lane.b32.xlu2 %v511_v26, %s912_s25  ;;  %567 = vrot.lane.b32.xlu0 %v511_v26, %s911_s24 }
 0x1d7   : > { %555 = vrot.lane.b32.xlu2 %v511_v26, %s913_s26 }
 0x1df   : > { %v494_v62 = vpop.permute.xlu1 %493  ;;  %543 = vrot.lane.b32.xlu2 %v511_v26, %s914_s27 }
 0x1e0   : > { %v1100_v63 = vsel %vm487_vm14, %v494_v62, %v496_v0  ;;  %502 = vst.msk [vmem:[#allocation2] sm:$0xff] %vm501_vm7, %v494_v62  ;;  %vm1238_vm14 = vmmov %vm1236_vm11 }
 0x1e7   : > { %v1102_v27 = vld [vmem:[#allocation2] sm:$0xff] }
 0x1e8   : > { %527 = vrot.lane.b32.xlu2 %v1102_v27, %s916_s29  ;;  %551 = vrot.lane.b32.xlu0 %v1102_v27, %s913_s26  ;;  %v884_v28 = vpack.i.bf16 %v1100_v63, %v1102_v27 }
 0x1e9   : > { %563 = vrot.lane.b32.xlu1 %v1102_v27, %s911_s24 }
 0x1f0   : > { %539 = vrot.lane.b32.xlu0 %v1102_v27, %s914_s27  ;;  %565 = vrot.lane.b32.xlu2 %v1100_v63, %s911_s24 }
 0x1f1   : > { %589 = vrot.lane.b32.xlu1 %v511_v26, %s915_s28 }
 0x1f8   : > { %885 = vrot.lane.b32.xlu0 %v884_v28, %s915_s28  ;;  %515 = vrot.lane.b32.xlu2 %v1102_v27, %s917_s30 }
 0x1f9   : > { %531 = vrot.lane.b32.xlu1 %v511_v26, %s916_s29 }
 0x200   : > { %529 = vrot.lane.b32.xlu0 %v1100_v63, %s916_s29  ;;  %890 = vrot.lane.b32.xlu2 %v884_v28, %s918_s6 }
 0x201   : > { %880 = vrot.lane.b32.xlu1 %v884_v28, %s912_s25 }
 0x208   : > { %517 = vrot.lane.b32.xlu0 %v1100_v63, %s917_s30 }
 0x209   : > { %553 = vrot.lane.b32.xlu1 %v1100_v63, %s913_s26 }
 0x210   : > { %579 = vrot.lane.b32.xlu0 %v511_v26, %s918_s6 }
 0x211   : > { %541 = vrot.lane.b32.xlu1 %v1100_v63, %s914_s27 }
 0x219   : > { %519 = vrot.lane.b32.xlu1 %v511_v26, %s917_s30 }
 0x221   : > { %607 = vperm.xlu1 %894, %v506_v43  }
 0x229   : > { %v600_v29 = vpop.permute.xlu2 %599 }
 0x231   : > { %v556_v30 = vpop.permute.xlu2 %555 }
 0x239   : > { %v544_v31 = vpop.permute.xlu2 %543 }
 0x241   : > { %v568_v33 = vpop.permute.xlu0 %567 }
 0x242   : > { %v528_v32 = vpop.permute.xlu2 %527 }
 0x24a   : > { %v566_v34 = vpop.permute.xlu2 %565 }
 0x24b   : > { %v570_v35 = vsel %vm310_vm0, %v566_v34, %v568_v33 }
 0x24c   : > { %831 = vmatpush.msk.msra.mxu3 %vm1007_vm2, %v570_v35 }
 0x252   : > { %v516_v50 = vpop.permute.xlu2 %515 }
 0x25a   : > { %v552_v36 = vpop.permute.xlu0 %551  ;;  %v891_v60 = vpop.permute.xlu2 %890 }
 0x25b   : > { %v564_v37 = vpop.permute.xlu1 %563  ;;  %v893_v3 = vunpack.i.h.bf16 %v891_v60  ;;  %v892_v5 = vunpack.i.l.bf16 %v891_v60 }
 0x25c   : > { %v569_v38 = vsel %vm310_vm0, %v564_v37, %v566_v34  ;;  %vm1230_vm0 = vcmask 900096  }
 0x25d   : > { %824 = vmatpush.msk.msra.mxu2 %vm1003_vm1, %v569_v38  ;;  %v581_v10 = vsel %vm1237_vm12, %v892_v5, %v893_v3 }
 0x262   : > { %v540_v39 = vpop.permute.xlu0 %539 }
 0x263   : > { %v590_v40 = vpop.permute.xlu1 %589 }
 0x26a   : > { %v886_v42 = vpop.permute.xlu0 %885 }
 0x26b   : > { %v532_v41 = vpop.permute.xlu1 %531  ;;  %v888_v55 = vunpack.i.h.bf16 %v886_v42  ;;  %v887_v56 = vunpack.i.l.bf16 %v886_v42 }
 0x272   : > { %v530_v49 = vpop.permute.xlu0 %529 }
 0x273   : > { %v881_v44 = vpop.permute.xlu1 %880  ;;  %v533_v6 = vsel %vm1234_vm9, %v528_v32, %v530_v49  ;;  %v534_v4 = vsel %vm1235_vm10, %v530_v49, %v532_v41 }
 0x274   : > { %v883_v45 = vunpack.i.h.bf16 %v881_v44  ;;  %v882_v46 = vunpack.i.l.bf16 %v881_v44 }
 0x276   : > { %v601_v47 = vsel %vm345_vm3, %v882_v46, %v883_v45  ;;  %v602_v48 = vsel %vm345_vm3, %v883_v45, %v600_v29  ;;  %vm1231_vm3 = vmmov %vm1230_vm0 }
 0x277   : > { %621 = vmatpush.msra.mxu2 %v601_v47  ;;  %641 = vmatpush.msra.mxu3 %v602_v48 }
 0x27a   : > { %v518_v54 = vpop.permute.xlu0 %517 }
 0x27b   : > { %v554_v51 = vpop.permute.xlu1 %553  ;;  %v521_v7 = vsel %vm1236_vm11, %v516_v50, %v518_v54 }
 0x27c   : > { %v557_v52 = vsel %vm297_vm4, %v552_v36, %v554_v51  ;;  %v558_v53 = vsel %vm297_vm4, %v554_v51, %v556_v30  ;;  %vm1232_vm4 = vcmask 908288  }
 0x27d   : > { %825 = vmatpush.msk.msra.mxu2 %vm1019_vm5, %v557_v52  ;;  %832 = vmatpush.msk.msra.mxu3 %vm1023_vm6, %v558_v53  ;;  %v591_v61 = vsel %vm1232_vm4, %v887_v56, %v888_v55  ;;  %vm1233_vm8 = vmmov %vm1232_vm4 }
 0x27e   : > { %v592_v2 = vsel %vm1233_vm8, %v888_v55, %v590_v40 }
 0x282   : > { %v580_v8 = vpop.permute.xlu0 %579 }
 0x283   : > { %v542_v57 = vpop.permute.xlu1 %541  ;;  %v582_v15 = vsel %vm1239_vm15, %v893_v3, %v580_v8 }
 0x284   : > { %v545_v58 = vsel %vm1230_vm0, %v540_v39, %v542_v57  ;;  %v546_v59 = vsel %vm1231_vm3, %v542_v57, %v544_v31 }
 0x285   : > { %826 = vmatpush.msk.msra.mxu2 %vm1003_vm1, %v545_v58  ;;  %833 = vmatpush.msk.msra.mxu3 %vm1007_vm2, %v546_v59 }
 0x287   : > { %624 = vmatpush.msra.mxu2 %v591_v61  ;;  %644 = vmatpush.msra.mxu3 %v592_v2 }
 0x289   : > { %827 = vmatpush.msk.msra.mxu2 %vm1019_vm5, %v533_v6  ;;  %834 = vmatpush.msk.msra.mxu3 %vm1023_vm6, %v534_v4 }
 0x28b   : > { %v520_v9 = vpop.permute.xlu1 %519  ;;  %828 = vmatpush.msk.msra.mxu2 %vm1003_vm1, %v521_v7  ;;  %vm1240_vm1 = vcmask 588800  }
 0x28c   : > { %v522_v11 = vsel %vm1238_vm14, %v518_v54, %v520_v9  ;;  %vm1241_vm13 = vmmov %vm1240_vm1 }
 0x28d   : > { %627 = vmatpush.msra.mxu2 %v581_v10  ;;  %835 = vmatpush.msk.msra.mxu3 %vm1007_vm2, %v522_v11 }
 0x28f   : > { %829 = vmatpush.msk.msra.mxu2 %vm1019_vm5, %v1102_v27  ;;  %647 = vmatpush.msra.mxu3 %v582_v15 }
 0x290   : > { %830 = vmatmul.msk.f32.vlgmr.msra.gmra.mxu2 %vm1240_vm1, %v505_v12 }
 0x291   : > { %836 = vmatpush.msk.msra.mxu3 %vm1023_vm6, %v1100_v63 }
 0x292   : > { %837 = vmatmul.msk.f32.vlgmr.msra.gmra.mxu3 %vm1241_vm13, %v505_v12 }
 0x293   : > { %v608_v13 = vpop.permute.xlu1 %607 }
 0x313   : > { %v630_v14 = vpop.f32.mrf.mxu2 }
 0x314   : > { %v1183_v16 = vadd.f32 %v630_v14, %v608_v13 }
 0x315   : > { %v650_v17 = vpop.f32.mrf.mxu3 }
 0x316   : > { %v1186_v18 = vmul.f32 0.70710677, %v1183_v16  ;;  %v1188_v19 = vadd.f32 %v650_v17, %v608_v13 }
 0x318   : > { %v657_v24 = vmul.f32 %v1186_v18, %v1186_v18  ;;  %v1193_v20 = vmul.f32 0.70710677, %v1188_v19 }
 0x31a   : > { %v658_v25 = vmin.f32 %v657_v24, 16.0  ;;  %v697_v21 = vmul.f32 %v1193_v20, %v1193_v20 }
 0x31c   : > { %v659_v1 = vmul.f32 2.1237322e-06, %v658_v25  ;;  %v670_v0 = vmul.f32 3.8918573e-05, %v658_v25  ;;  %v698_v26 = vmin.f32 %v697_v21, 16.0 }
 0x31e   : > { %v660_v62 = vadd.f32 0.00028619796, %v659_v1  ;;  %v671_v63 = vadd.f32 0.001143296, %v670_v0  ;;  %v699_v27 = vmul.f32 2.1237322e-06, %v698_v26 }
 0x31f   : > { %v710_v28 = vmul.f32 3.8918573e-05, %v698_v26 }
 0x320   : > { %v661_v29 = vmul.f32 %v660_v62, %v658_v25  ;;  %v672_v30 = vmul.f32 %v671_v63, %v658_v25  ;;  %v700_v31 = vadd.f32 0.00028619796, %v699_v27 }
 0x321   : > { %v711_v32 = vadd.f32 0.001143296, %v710_v28 }
 0x322   : > { %v673_v33 = vadd.f32 0.014752088, %v672_v30  ;;  %v701_v34 = vmul.f32 %v700_v31, %v698_v26  ;;  %v662_v35 = vadd.f32 0.0036580483, %v661_v29  ;;  %v653_v30 = vmul.f32 0.5, %v1183_v16 }
 0x323   : > { %v712_v36 = vmul.f32 %v711_v32, %v698_v26 }
 0x324   : > { %v674_v37 = vmul.f32 %v673_v33, %v658_v25  ;;  %v702_v38 = vadd.f32 0.0036580483, %v701_v34  ;;  %v663_v41 = vmul.f32 %v662_v35, %v658_v25  ;;  %v654_v33 = vmul.f32 0.5, %v1188_v19 }
 0x325   : > { %v713_v39 = vadd.f32 0.014752088, %v712_v36 }
 0x326   : > { %v675_v40 = vadd.f32 0.112945676, %v674_v37  ;;  %v703_v44 = vmul.f32 %v702_v38, %v698_v26  ;;  %v664_v47 = vadd.f32 0.05243302, %v663_v41 }
 0x327   : > { %v714_v42 = vmul.f32 %v713_v39, %v698_v26 }
 0x328   : > { %v676_v43 = vmul.f32 %v675_v40, %v658_v25  ;;  %v704_v50 = vadd.f32 0.05243302, %v703_v44  ;;  %v665_v53 = vmul.f32 %v664_v47, %v658_v25 }
 0x329   : > { %v715_v45 = vadd.f32 0.112945676, %v714_v42 }
 0x32a   : > { %v677_v46 = vadd.f32 0.4994258, %v676_v43  ;;  %v705_v55 = vmul.f32 %v704_v50, %v698_v26  ;;  %v666_v57 = vadd.f32 0.18741608, %v665_v53 }
 0x32b   : > { %v716_v48 = vmul.f32 %v715_v45, %v698_v26 }
 0x32c   : > { %v678_v49 = vmul.f32 %v677_v46, %v658_v25  ;;  %v706_v58 = vadd.f32 0.18741608, %v705_v55  ;;  %v667_v60 = vmul.f32 %v666_v57, %v658_v25 }
 0x32d   : > { %v717_v51 = vadd.f32 0.4994258, %v716_v48 }
 0x32e   : > { %v679_v52 = vadd.f32 1.0, %v678_v49  ;;  %v707_v5 = vmul.f32 %v706_v58, %v698_v26  ;;  %v668_v7 = vadd.f32 1.1283791, %v667_v60 }
 0x32f   : > { %v718_v54 = vmul.f32 %v717_v51, %v698_v26 }
 0x330   : > { %899 = vrcp.f32 %v679_v52  ;;  %v691_v6 = vand.u32 2147483648, %v679_v52  ;;  %v689_v9 = vand.u32 2147483647, %v679_v52  ;;  %vm685_vm5 = vweird.f32 %v679_v52 }
 0x331   : > { %v719_v56 = vadd.f32 1.0, %v718_v54  ;;  %v708_v12 = vadd.f32 1.1283791, %v707_v5  ;;  %v669_v24 = vmul.f32 %v668_v7, %v1186_v18 }
 0x332   : > { %v692_v13 = vor.u32 1.1754944e-38, %v691_v6  ;;  %vm690_vm0 = vcmp.eq.f32.partialorder %v689_v9, 8.507059e+37 }
 0x333   : > { %901 = vrcp.f32 %v719_v56  ;;  %v731_v15 = vand.u32 2147483648, %v719_v56  ;;  %v729_v17 = vand.u32 2147483647, %v719_v56  ;;  %vm725_vm3 = vweird.f32 %v719_v56 }
 0x334   : > { %v709_v62 = vmul.f32 %v708_v12, %v1193_v20 }
 0x335   : > { %v732_v26 = vor.u32 1.1754944e-38, %v731_v15  ;;  %vm730_vm8 = vcmp.eq.f32.partialorder %v729_v17, 8.507059e+37 }
 0x336   : > { %v900_v59 = vpop.eup %899 }
 0x337   : > { %v681_v61 = vmul.f32 %v900_v59, %v679_v52  ;;  %vm686_vm2 = vweird.f32 %v900_v59 }
 0x338   : > { %vm687_vm6 = vmor %vm685_vm5, %vm686_vm2 }
 0x339   : > { %v902_v2 = vpop.eup %901  ;;  %v682_v3 = vsub.f32 1.0, %v681_v61 }
 0x33a   : > { %v721_v4 = vmul.f32 %v902_v2, %v719_v56  ;;  %vm726_vm7 = vweird.f32 %v902_v2 }
 0x33b   : > { %v683_v8 = vmul.f32 %v900_v59, %v682_v3  ;;  %vm727_vm4 = vmor %vm725_vm3, %vm726_vm7 }
 0x33c   : > { %v722_v10 = vsub.f32 1.0, %v721_v4 }
 0x33d   : > { %v684_v11 = vadd.f32 %v900_v59, %v683_v8 }
 0x33e   : > { %v723_v14 = vmul.f32 %v902_v2, %v722_v10 }
 0x33f   : > { %v688_v25 = vsel %vm687_vm6, %v900_v59, %v684_v11 }
 0x340   : > { %v693_v21 = vsel %vm690_vm0, %v692_v13, %v688_v25  ;;  %v724_v1 = vadd.f32 %v902_v2, %v723_v14 }
 0x341   : > { %v694_v0 = vmul.f32 %v693_v21, %v669_v24 }
 0x342   : > { %v728_v63 = vsel %vm727_vm4, %v902_v2, %v724_v1 }
 0x343   : > { %v838_v27 = vclamps-f32 %v694_v0, 1.0  ;;  %v733_v28 = vsel %vm730_vm8, %v732_v26, %v728_v63 }
 0x344   : > { %v734_v29 = vmul.f32 %v733_v28, %v709_v62 }
 0x345   : > { %v737_v31 = vadd.f32 1.0, %v838_v27 }
 0x346   : > { %v839_v18 = vclamps-f32 %v734_v29, 1.0 }
 0x347   : > { %v739_v32 = vmul.f32 %v737_v31, %v653_v30 }
 0x348   : > { %v738_v34 = vadd.f32 1.0, %v839_v18 }
 0x349   : > { %v741_v20 = vadd.f32 %v739_v32, %v1090_v23 }
 0x34a   : > { %v740_v35 = vmul.f32 %v738_v34, %v654_v33 }
 0x34b   : > { %743 = vst [vmem:[%s224_s21] sm:$0xff] %v741_v20 }
 0x34c   : > { %v742_v36 = vadd.f32 %v740_v35, %v1088_v22 }
 0x34e   : > { %744 = vst [vmem:[%s224_s21 + $0x8] sm:$0xff] %v742_v36 }
 0x34f PF: > { %s15_s18 = sadd.s32 1, %s909_s18  }
 0x350   : > { %p12_p4 = scmp.ge.s32.totalorder %s15_s18, 4  }
 0x352   :  { %14 = sbr.rel (!%p12_p4) target bundleno = 1 (0x1), region = 70 }

</bundles_post_ra>
